<compile_context>
chip_gen: v7x
topology: tpu7x:2x2x1
jax: 0.10.0
libtpu: 0.0.40
codegen_flags: <defaults>
</compile_context>

<pallas_src>
import functools

import jax
import jax.numpy as jnp
import numpy as np
from jax.experimental import pallas as pl
from jax.experimental.pallas import tpu as pltpu


# ---------------------------------------------------------------------------
# Kernel: fused (input projection + recurrence) over one (batch_tile, time_chunk)
# ---------------------------------------------------------------------------
def _lstm_chunk_kernel(x_ref, wih_ref, whh_ref, b_ref, h0_ref, c0_ref,
                       out_ref, hn_ref, cn_ref,
                       gates_scr, h_scr, c_scr,
                       *, hidden_size, chunk, unroll):
    H = hidden_size
    G = 4 * H
    c_idx = pl.program_id(1)                 # time-chunk axis ("arbitrary")

    # (Re)load the initial hidden/cell state at the start of every batch tile.
    @pl.when(c_idx == 0)
    def _():
        h_scr[...] = h0_ref[...].astype(jnp.float32)
        c_scr[...] = c0_ref[...].astype(jnp.float32)

    # Fused input projection for the whole chunk: one MXU matmul
    # (chunk*Bt, I) x (I, 4H) -> gates_x kept in VMEM (no HBM round trip).
    bt = x_ref.shape[1]
    in_dim = x_ref.shape[2]
    x2d = x_ref[...].reshape(chunk * bt, in_dim)
    gates_scr[...] = (
        jnp.dot(x2d, wih_ref[...], preferred_element_type=jnp.float32)
        + b_ref[...]
    ).reshape(chunk, bt, G)

    def step(t, carry):
        h_prev, c_prev = carry
        gates = gates_scr[t] + jnp.dot(
            h_prev.astype(whh_ref.dtype), whh_ref[...],
            preferred_element_type=jnp.float32)
        # Gate layout [i, f, o, g]: one contiguous "sigmoid" slab + one tanh.
        # sigmoid(x) == 0.5*tanh(0.5*x) + 0.5 -> a single EUP push per element.
        sig = 0.5 * jnp.tanh(0.5 * gates[:, : 3 * H]) + 0.5
        g_g = jnp.tanh(gates[:, 3 * H:])
        i_g = sig[:, 0 * H:1 * H]
        f_g = sig[:, 1 * H:2 * H]
        o_g = sig[:, 2 * H:3 * H]
        c_t = f_g * c_prev + i_g * g_g
        h_t = o_g * jnp.tanh(c_t)
        out_ref[t] = h_t.astype(out_ref.dtype)
        return h_t, c_t

    h, c = jax.lax.fori_loop(0, chunk, step, (h_scr[...], c_scr[...]),
                             unroll=unroll)

    # Carry across time chunks.
    h_scr[...] = h
    c_scr[...] = c

    # Final-state outputs: resident blocks, written only on the last chunk.
    @pl.when(c_idx == pl.num_programs(1) - 1)
    def _():
        hn_ref[...] = h.astype(hn_ref.dtype)
        cn_ref[...] = c.astype(cn_ref.dtype)


# ---------------------------------------------------------------------------
# Wrapper
# ---------------------------------------------------------------------------
def _snap_divisor(n, cap, multiple=1):
    """Largest divisor of n that is <= cap and a multiple of `multiple`
    (falls back to n itself)."""
    cap = max(1, min(n, int(cap)))
    for d in range(cap, 0, -1):
        if n % d == 0 and d % multiple == 0:
            return d
    return n


def _vmem_sizes():
    """Per-generation VMEM limit (requested) and block/scratch budget."""
    try:
        cap = int(pltpu.get_tpu_info().vmem_capacity_bytes)
    except Exception:
        cap = 64 * 1024 * 1024                 # conservative (v7x per-TC VMEM)
    if cap < 32 * 1024 * 1024:
        cap = 64 * 1024 * 1024
    limit = int(cap * 0.75)                    # scoped-VMEM limit we request
    budget = int(cap * 0.50)                   # what our blocks + scratch may use
    return limit, budget


def lstm_forward_pallas(x, w_ih, w_hh, b_ih, b_hh, h0, c0, *,
                        batch_tile=None, time_chunk=None,
                        compute_dtype=jnp.float32, out_dtype=None):
    """Single-layer LSTM over a sequence.

    x: (T, B, I); w_ih: (4H, I); w_hh: (4H, H); b_*: (4H,); h0/c0: (B, H).
    Returns out (T, B, H), h_n (B, H), c_n (B, H).
    compute_dtype=jnp.bfloat16 switches the MXU operands to bf16 (fp32 accumulate).
    """
    x = jnp.asarray(x)
    T, B, I = x.shape
    H = w_hh.shape[1]
    G = 4 * H
    out_dtype = jnp.dtype(out_dtype if out_dtype is not None else x.dtype)
    compute_dtype = jnp.dtype(compute_dtype)

    # PyTorch gate order [i, f, g, o] -> [i, f, o, g] (sigmoid gates contiguous).
    def _permute(p):
        i, f, g, o = jnp.split(jnp.asarray(p, jnp.float32), 4, axis=0)
        return jnp.concatenate([i, f, o, g], axis=0)

    wih_t = _permute(w_ih).T.astype(compute_dtype)               # (I, 4H)
    whh_t = _permute(w_hh).T.astype(compute_dtype)               # (H, 4H)
    bias = (_permute(b_ih) + _permute(b_hh)).reshape(1, G)       # (1, 4H) fp32

    if compute_dtype != jnp.float32:
        x = x.astype(compute_dtype)       # halves the x HBM stream for bf16 MXU
    h0 = jnp.asarray(h0, jnp.float32)
    c0 = jnp.asarray(c0, jnp.float32)

    # Pad batch to a multiple of 8 (sublane) so in-kernel reshapes stay layout-free.
    B_pad = -(-B // 8) * 8
    if B_pad != B:
        x = jnp.pad(x, ((0, 0), (0, B_pad - B), (0, 0)))
        h0 = jnp.pad(h0, ((0, B_pad - B), (0, 0)))
        c0 = jnp.pad(c0, ((0, B_pad - B), (0, 0)))

    # ---- batch tile (leading, "parallel" grid axis) -------------------------
    if batch_tile is None:
        batch_tile = 512
    bt = _snap_divisor(B_pad, batch_tile, multiple=8)

    # ---- time chunk sized from the per-generation VMEM budget ---------------
    vmem_limit, vmem_budget = _vmem_sizes()
    xb = x.dtype.itemsize
    wb = compute_dtype.itemsize
    ob = out_dtype.itemsize
    fixed = (2 * (I + H) * G * wb          # resident W_ih^T / W_hh^T (dbl-buffered)
             + 2 * G * 4                   # bias
             + 2 * 2 * bt * H * 4          # h0 / c0 tiles (dbl-buffered)
             + 2 * bt * H * 4)             # h / c carry scratch
    per_step = bt * (2 * I * xb            # x chunk (dbl-buffered)
                     + 2 * H * ob          # out chunk (dbl-buffered)
                     + G * 4)              # gates_x scratch (single)
    max_chunk = max(1, int((vmem_budget - fixed) // max(per_step, 1)))
    if time_chunk is None:
        time_chunk = max_chunk
    tc = _snap_divisor(T, min(T, int(time_chunk), max_chunk))

    n_btiles = B_pad // bt
    n_chunks = T // tc

    kernel = functools.partial(_lstm_chunk_kernel, hidden_size=H, chunk=tc,
                               unroll=max(1, min(tc, 8)))

    out_shapes = (
        jax.ShapeDtypeStruct((T, B_pad, H), out_dtype),   # out
        jax.ShapeDtypeStruct((B_pad, H), out_dtype),      # h_n
        jax.ShapeDtypeStruct((B_pad, H), out_dtype),      # c_n
    )

    grid_spec = pltpu.PrefetchScalarGridSpec(
        num_scalar_prefetch=0,
        grid=(n_btiles, n_chunks),
        in_specs=[
            pl.BlockSpec((tc, bt, I), lambda b, c: (c, b, 0)),   # x chunk
            pl.BlockSpec((I, G), lambda b, c: (0, 0)),           # W_ih^T (resident)
            pl.BlockSpec((H, G), lambda b, c: (0, 0)),           # W_hh^T (resident)
            pl.BlockSpec((1, G), lambda b, c: (0, 0)),           # bias (resident)
            pl.BlockSpec((bt, H), lambda b, c: (b, 0)),          # h0 tile
            pl.BlockSpec((bt, H), lambda b, c: (b, 0)),          # c0 tile
        ],
        out_specs=[
            pl.BlockSpec((tc, bt, H), lambda b, c: (c, b, 0)),   # out chunk
            pl.BlockSpec((bt, H), lambda b, c: (b, 0)),          # h_n tile
            pl.BlockSpec((bt, H), lambda b, c: (b, 0)),          # c_n tile
        ],
        scratch_shapes=[
            pltpu.VMEM((tc, bt, G), jnp.float32),                # gates_x chunk
            pltpu.VMEM((bt, H), jnp.float32),                    # h carry
            pltpu.VMEM((bt, H), jnp.float32),                    # c carry
        ],
    )

    out, hn, cn = pl.pallas_call(
        kernel,
        out_shape=out_shapes,
        grid_spec=grid_spec,
        compiler_params=pltpu.CompilerParams(
            dimension_semantics=("parallel", "arbitrary"),
            vmem_limit_bytes=vmem_limit),
    )(x, wih_t, whh_t, bias, h0, c0)

    if B_pad != B:
        out = out[:, :B, :]
        hn = hn[:B, :]
        cn = cn[:B, :]
    return out, hn, cn


# ---------------------------------------------------------------------------
# rsl_rl utilities / Memory module
# ---------------------------------------------------------------------------
def unpad_trajectories(trajectories, masks):
    """rsl_rl unpad_trajectories.  Output shape is data-dependent (boolean gather),
    so it runs host-side in NumPy rather than in a Pallas kernel."""
    tr = np.asarray(trajectories)                  # (T, B, H)
    m = np.asarray(masks).astype(bool)             # (T, B)
    T = tr.shape[0]
    flat = tr.transpose(1, 0, 2)[m.transpose(1, 0)]          # (n_valid, H)
    return jnp.asarray(flat.reshape(-1, T, tr.shape[-1]).transpose(1, 0, 2))


class Memory:
    """JAX port of rsl_rl Memory (type='lstm', num_layers=1)."""

    def __init__(self, input_size, type='lstm', num_layers=1, hidden_size=256,
                 key=jax.random.PRNGKey(0)):
        assert type.lower() == 'lstm', "only LSTM implemented in this port"
        assert num_layers == 1, "only num_layers=1 implemented in this port"
        self.input_size = input_size
        self.hidden_size = hidden_size
        H, I = hidden_size, input_size
        k = 1.0 / np.sqrt(H)
        k0, k1, k2, k3 = jax.random.split(key, 4)
        # PyTorch nn.LSTM init: U(-1/sqrt(H), 1/sqrt(H)) for all params.
        self.w_ih = jax.random.uniform(k0, (4 * H, I), jnp.float32, -k, k)
        self.w_hh = jax.random.uniform(k1, (4 * H, H), jnp.float32, -k, k)
        self.b_ih = jax.random.uniform(k2, (4 * H,), jnp.float32, -k, k)
        self.b_hh = jax.random.uniform(k3, (4 * H,), jnp.float32, -k, k)
        self.hidden_states = None

    def forward(self, input, masks=None, hidden_states=None):
        batch_mode = masks is not None
        if batch_mode:
            if hidden_states is None:
                raise ValueError(
                    'Hidden states not passed to memory module during policy update')
            h0, c0 = hidden_states            # each (1, B, H)
            out, _, _ = lstm_forward_pallas(
                input, self.w_ih, self.w_hh, self.b_ih, self.b_hh, h0[0], c0[0])
            return unpad_trajectories(out, masks)
        else:
            x = jnp.asarray(input)[None, ...]  # (1, B, I)
            B = x.shape[1]
            if self.hidden_states is None:
                h0 = jnp.zeros((1, B, self.hidden_size), jnp.float32)
                c0 = jnp.zeros((1, B, self.hidden_size), jnp.float32)
            else:
                h0, c0 = self.hidden_states
            out, hn, cn = lstm_forward_pallas(
                x, self.w_ih, self.w_hh, self.b_ih, self.b_hh, h0[0], c0[0])
            self.hidden_states = (hn[None, ...], cn[None, ...])
            return out

    def reset(self, dones=None):
        if self.hidden_states is None:
            return
        if dones is None:
            self.hidden_states = tuple(jnp.zeros_like(h) for h in self.hidden_states)
            return
        dones = jnp.asarray(dones)
        B = self.hidden_states[0].shape[-2]
        if dones.dtype == jnp.bool_:
            mask = dones
        else:
            mask = jnp.zeros((B,), bool).at[dones].set(True)
        self.hidden_states = tuple(
            jnp.where(mask[None, :, None], 0.0, h) for h in self.hidden_states)


# ---------------------------------------------------------------------------
# Pure-JAX reference (PyTorch gate order i,f,g,o) for validation
# ---------------------------------------------------------------------------
def _lstm_ref(x, w_ih, w_hh, b_ih, b_hh, h0, c0):
    H = w_hh.shape[1]

    def step(carry, x_t):
        h, c = carry
        g = x_t @ w_ih.T + h @ w_hh.T + b_ih + b_hh
        i = jax.nn.sigmoid(g[:, 0 * H:1 * H])
        f = jax.nn.sigmoid(g[:, 1 * H:2 * H])
        gg = jnp.tanh(g[:, 2 * H:3 * H])
        o = jax.nn.sigmoid(g[:, 3 * H:4 * H])
        c = f * c + i * gg
        h = o * jnp.tanh(c)
        return (h, c), h

    (hn, cn), out = jax.lax.scan(step, (h0, c0), x)
    return out, hn, cn


if __name__ == "__main__":
    key = jax.random.PRNGKey(0)
    k_param, k_in, k_seq, k_h, k_c = jax.random.split(key, 5)

    input_size, hidden_size = 32, 32
    B, T = 8, 8

    mem = Memory(input_size, type='lstm', num_layers=1,
                 hidden_size=hidden_size, key=k_param)

    # --- inference path (no masks): input (B, I), unsqueezed to seq len 1 ---
    obs = jax.random.normal(k_in, (B, input_size), jnp.float32)
    out_infer = jax.block_until_ready(mem.forward(obs))            # (1, B, H)

    # --- batch (policy-update) path: (T, B, I) with hidden states ---
    seq = jax.random.normal(k_seq, (T, B, input_size), jnp.float32)
    h0 = jax.random.normal(k_h, (1, B, hidden_size), jnp.float32)
    c0 = jax.random.normal(k_c, (1, B, hidden_size), jnp.float32)
    masks = jnp.ones((T, B), bool)
    out_batch = jax.block_until_ready(
        mem.forward(seq, masks=masks, hidden_states=(h0, c0)))

    # fp32 path vs pure-JAX LSTM reference
    ref_out, _, _ = _lstm_ref(seq, mem.w_ih, mem.w_hh, mem.b_ih, mem.b_hh,
                              h0[0], c0[0])
    np.testing.assert_allclose(np.asarray(out_batch), np.asarray(ref_out),
                               rtol=1e-5, atol=1e-5)

    ref_out1, ref_hn, ref_cn = _lstm_ref(obs[None], mem.w_ih, mem.w_hh,
                                         mem.b_ih, mem.b_hh,
                                         jnp.zeros((B, hidden_size)),
                                         jnp.zeros((B, hidden_size)))
    np.testing.assert_allclose(np.asarray(out_infer), np.asarray(ref_out1),
                               rtol=1e-5, atol=1e-5)
    np.testing.assert_allclose(np.asarray(mem.hidden_states[0][0]),
                               np.asarray(ref_hn), rtol=1e-5, atol=1e-5)
    np.testing.assert_allclose(np.asarray(mem.hidden_states[1][0]),
                               np.asarray(ref_cn), rtol=1e-5, atol=1e-5)

    # bf16 MXU-operand path (production config on v5e/v6e/v7x; looser tolerance)
    out_bf16, _, _ = lstm_forward_pallas(
        seq, mem.w_ih, mem.w_hh, mem.b_ih, mem.b_hh, h0[0], c0[0],
        compute_dtype=jnp.bfloat16)
    out_bf16 = jax.block_until_ready(out_bf16)
    np.testing.assert_allclose(np.asarray(out_bf16, np.float32),
                               np.asarray(ref_out), rtol=1e-1, atol=1e-1)

    print("KERNEL_OK")
</pallas_src>

<mosaic_0001>
module attributes {stable_mosaic.version = 11 : i64} {
  func.func @_lstm_chunk_kernel(%arg0: i32, %arg1: i32, %arg2: memref<1x8x32xf32, #tpu.memory_space<vmem>>, %arg3: memref<32x128xf32, #tpu.memory_space<vmem>>, %arg4: memref<32x128xf32, #tpu.memory_space<vmem>>, %arg5: memref<1x128xf32, #tpu.memory_space<vmem>>, %arg6: memref<8x32xf32, #tpu.memory_space<vmem>>, %arg7: memref<8x32xf32, #tpu.memory_space<vmem>>, %arg8: memref<1x8x32xf32, #tpu.memory_space<vmem>>, %arg9: memref<8x32xf32, #tpu.memory_space<vmem>>, %arg10: memref<8x32xf32, #tpu.memory_space<vmem>>, %arg11: memref<1x8x128xf32, #tpu.memory_space<vmem>>, %arg12: memref<8x32xf32, #tpu.memory_space<vmem>>, %arg13: memref<8x32xf32, #tpu.memory_space<vmem>>) attributes {dimension_semantics = [#tpu.dimension_semantics<parallel>, #tpu.dimension_semantics<arbitrary>], iteration_bounds = array<i64: 1, 1>, scalar_prefetch = 0 : i64, scratch_operands = 3 : i64, tpu.core_type = #tpu.core_type<tc>, window_params = [{transform_indices = @transform_0, window_bounds = array<i64: 1, 8, 32>}, {pipeline_mode = #tpu.pipeline_mode<synchronous>, transform_indices = @transform_1, window_bounds = array<i64: 32, 128>}, {pipeline_mode = #tpu.pipeline_mode<synchronous>, transform_indices = @transform_2, window_bounds = array<i64: 32, 128>}, {pipeline_mode = #tpu.pipeline_mode<synchronous>, transform_indices = @transform_3, window_bounds = array<i64: 1, 128>}, {transform_indices = @transform_4, window_bounds = array<i64: 8, 32>}, {transform_indices = @transform_5, window_bounds = array<i64: 8, 32>}, {transform_indices = @transform_6, window_bounds = array<i64: 1, 8, 32>}, {transform_indices = @transform_7, window_bounds = array<i64: 8, 32>}, {transform_indices = @transform_8, window_bounds = array<i64: 8, 32>}]} {
    %c0_i32 = arith.constant 0 : i32
    %0 = arith.cmpi eq, %arg1, %c0_i32 : i32
    %1 = arith.extui %0 : i1 to i32
    %c0_i32_0 = arith.constant 0 : i32
    %2 = arith.cmpi ne, %1, %c0_i32_0 : i32
    scf.if %2 {
      %c0_31 = arith.constant 0 : index
      %c0_32 = arith.constant 0 : index
      %47 = vector.load %arg6[%c0_31, %c0_32] : memref<8x32xf32, #tpu.memory_space<vmem>>, vector<8x32xf32>
      %c0_33 = arith.constant 0 : index
      %c0_34 = arith.constant 0 : index
      %48 = vector.load %arg12[%c0_33, %c0_34] : memref<8x32xf32, #tpu.memory_space<vmem>>, vector<8x32xf32>
      tpu.vector_store %arg12[%c0_33, %c0_34], %47 {strides = array<i32>} : memref<8x32xf32, #tpu.memory_space<vmem>>, vector<8x32xf32>,
      %c0_35 = arith.constant 0 : index
      %c0_36 = arith.constant 0 : index
      %49 = vector.load %arg7[%c0_35, %c0_36] : memref<8x32xf32, #tpu.memory_space<vmem>>, vector<8x32xf32>
      %c0_37 = arith.constant 0 : index
      %c0_38 = arith.constant 0 : index
      %50 = vector.load %arg13[%c0_37, %c0_38] : memref<8x32xf32, #tpu.memory_space<vmem>>, vector<8x32xf32>
      tpu.vector_store %arg13[%c0_37, %c0_38], %49 {strides = array<i32>} : memref<8x32xf32, #tpu.memory_space<vmem>>, vector<8x32xf32>,
    } else {
    }
    %c0 = arith.constant 0 : index
    %c0_1 = arith.constant 0 : index
    %c0_2 = arith.constant 0 : index
    %3 = vector.load %arg2[%c0, %c0_1, %c0_2] : memref<1x8x32xf32, #tpu.memory_space<vmem>>, vector<1x8x32xf32>
    %4 = vector.shape_cast %3 : vector<1x8x32xf32> to vector<8x32xf32>
    %c0_3 = arith.constant 0 : index
    %c0_4 = arith.constant 0 : index
    %5 = vector.load %arg3[%c0_3, %c0_4] : memref<32x128xf32, #tpu.memory_space<vmem>>, vector<32x128xf32>
    %cst = arith.constant dense<0.000000e+00> : vector<8x128xf32>
    %6 = tpu.matmul %4, %5, %cst {dimension_numbers = #tpu.dot_dimension_numbers<[1], [0], [0], [1], [0, 0, 1, 1], [], []>} : vector<8x32xf32>, vector<32x128xf32>, vector<8x128xf32> -> vector<8x128xf32>
    %c0_5 = arith.constant 0 : index
    %c0_6 = arith.constant 0 : index
    %7 = vector.load %arg5[%c0_5, %c0_6] : memref<1x128xf32, #tpu.memory_space<vmem>>, vector<1x128xf32>
    %8 = vector.broadcast %7 : vector<1x128xf32> to vector<8x128xf32>
    %9 = arith.addf %6, %8 : vector<8x128xf32>
    %10 = vector.shape_cast %9 : vector<8x128xf32> to vector<1x8x128xf32>
    %c0_7 = arith.constant 0 : index
    %c0_8 = arith.constant 0 : index
    %c0_9 = arith.constant 0 : index
    %11 = vector.load %arg11[%c0_7, %c0_8, %c0_9] : memref<1x8x128xf32, #tpu.memory_space<vmem>>, vector<1x8x128xf32>
    tpu.vector_store %arg11[%c0_7, %c0_8, %c0_9], %10 {strides = array<i32>} : memref<1x8x128xf32, #tpu.memory_space<vmem>>, vector<1x8x128xf32>,
    %c0_10 = arith.constant 0 : index
    %c0_11 = arith.constant 0 : index
    %12 = vector.load %arg12[%c0_10, %c0_11] : memref<8x32xf32, #tpu.memory_space<vmem>>, vector<8x32xf32>
    %c0_12 = arith.constant 0 : index
    %c0_13 = arith.constant 0 : index
    %13 = vector.load %arg13[%c0_12, %c0_13] : memref<8x32xf32, #tpu.memory_space<vmem>>, vector<8x32xf32>
    %c0_i32_14 = arith.constant 0 : i32
    %14 = arith.index_cast %c0_i32_14 : i32 to index
    %c0_15 = arith.constant 0 : index
    %c0_16 = arith.constant 0 : index
    %15 = vector.load %arg11[%14, %c0_15, %c0_16] : memref<1x8x128xf32, #tpu.memory_space<vmem>>, vector<1x8x128xf32>
    %16 = vector.shape_cast %15 : vector<1x8x128xf32> to vector<8x128xf32>
    %c0_17 = arith.constant 0 : index
    %c0_18 = arith.constant 0 : index
    %17 = vector.load %arg4[%c0_17, %c0_18] : memref<32x128xf32, #tpu.memory_space<vmem>>, vector<32x128xf32>
    %cst_19 = arith.constant dense<0.000000e+00> : vector<8x128xf32>
    %18 = tpu.matmul %12, %17, %cst_19 {dimension_numbers = #tpu.dot_dimension_numbers<[1], [0], [0], [1], [0, 0, 1, 1], [], []>} : vector<8x32xf32>, vector<32x128xf32>, vector<8x128xf32> -> vector<8x128xf32>
    %19 = arith.addf %16, %18 : vector<8x128xf32>
    %20 = vector.extract_strided_slice %19 {offsets = [0, 0], sizes = [8, 96], strides = [1, 1]} : vector<8x128xf32> to vector<8x96xf32>
    %cst_20 = arith.constant 5.000000e-01 : f32
    %21 = vector.broadcast %cst_20 : f32 to vector<8x96xf32>
    %22 = arith.mulf %21, %20 : vector<8x96xf32>
    %23 = math.tanh %22 : vector<8x96xf32>
    %cst_21 = arith.constant 5.000000e-01 : f32
    %24 = vector.broadcast %cst_21 : f32 to vector<8x96xf32>
    %25 = arith.mulf %24, %23 : vector<8x96xf32>
    %cst_22 = arith.constant 5.000000e-01 : f32
    %26 = vector.broadcast %cst_22 : f32 to vector<8x96xf32>
    %27 = arith.addf %25, %26 : vector<8x96xf32>
    %28 = vector.extract_strided_slice %19 {offsets = [0, 96], sizes = [8, 32], strides = [1, 1]} : vector<8x128xf32> to vector<8x32xf32>
    %29 = math.tanh %28 : vector<8x32xf32>
    %30 = vector.extract_strided_slice %27 {offsets = [0, 0], sizes = [8, 32], strides = [1, 1]} : vector<8x96xf32> to vector<8x32xf32>
    %31 = vector.extract_strided_slice %27 {offsets = [0, 32], sizes = [8, 32], strides = [1, 1]} : vector<8x96xf32> to vector<8x32xf32>
    %32 = vector.extract_strided_slice %27 {offsets = [0, 64], sizes = [8, 32], strides = [1, 1]} : vector<8x96xf32> to vector<8x32xf32>
    %33 = arith.mulf %31, %13 : vector<8x32xf32>
    %34 = arith.mulf %30, %29 : vector<8x32xf32>
    %35 = arith.addf %33, %34 : vector<8x32xf32>
    %36 = math.tanh %35 : vector<8x32xf32>
    %37 = arith.mulf %32, %36 : vector<8x32xf32>
    %38 = arith.index_cast %c0_i32_14 : i32 to index
    %c0_23 = arith.constant 0 : index
    %c0_24 = arith.constant 0 : index
    %39 = vector.load %arg8[%38, %c0_23, %c0_24] : memref<1x8x32xf32, #tpu.memory_space<vmem>>, vector<1x8x32xf32>
    %40 = vector.shape_cast %39 : vector<1x8x32xf32> to vector<8x32xf32>
    %41 = vector.shape_cast %37 : vector<8x32xf32> to vector<1x8x32xf32>
    tpu.vector_store %arg8[%38, %c0_23, %c0_24], %41 {strides = array<i32>} : memref<1x8x32xf32, #tpu.memory_space<vmem>>, vector<1x8x32xf32>,
    %c1_i32 = arith.constant 1 : i32
    %c0_25 = arith.constant 0 : index
    %c0_26 = arith.constant 0 : index
    %42 = vector.load %arg12[%c0_25, %c0_26] : memref<8x32xf32, #tpu.memory_space<vmem>>, vector<8x32xf32>
    tpu.vector_store %arg12[%c0_25, %c0_26], %37 {strides = array<i32>} : memref<8x32xf32, #tpu.memory_space<vmem>>, vector<8x32xf32>,
    %c0_27 = arith.constant 0 : index
    %c0_28 = arith.constant 0 : index
    %43 = vector.load %arg13[%c0_27, %c0_28] : memref<8x32xf32, #tpu.memory_space<vmem>>, vector<8x32xf32>
    tpu.vector_store %arg13[%c0_27, %c0_28], %35 {strides = array<i32>} : memref<8x32xf32, #tpu.memory_space<vmem>>, vector<8x32xf32>,
    %c0_i32_29 = arith.constant 0 : i32
    %44 = arith.cmpi eq, %arg1, %c0_i32_29 : i32
    %45 = arith.extui %44 : i1 to i32
    %c0_i32_30 = arith.constant 0 : i32
    %46 = arith.cmpi ne, %45, %c0_i32_30 : i32
    scf.if %46 {
      %c0_31 = arith.constant 0 : index
      %c0_32 = arith.constant 0 : index
      %47 = vector.load %arg9[%c0_31, %c0_32] : memref<8x32xf32, #tpu.memory_space<vmem>>, vector<8x32xf32>
      tpu.vector_store %arg9[%c0_31, %c0_32], %37 {strides = array<i32>} : memref<8x32xf32, #tpu.memory_space<vmem>>, vector<8x32xf32>,
      %c0_33 = arith.constant 0 : index
      %c0_34 = arith.constant 0 : index
      %48 = vector.load %arg10[%c0_33, %c0_34] : memref<8x32xf32, #tpu.memory_space<vmem>>, vector<8x32xf32>
      tpu.vector_store %arg10[%c0_33, %c0_34], %35 {strides = array<i32>} : memref<8x32xf32, #tpu.memory_space<vmem>>, vector<8x32xf32>,
    } else {
    }
    return
  }
  func.func @transform_0(%arg0: i32, %arg1: i32) -> (i32, i32, i32) {
    %c0_i32 = arith.constant 0 : i32
    %c0_i32_0 = arith.constant 0 : i32
    return %arg1, %arg0, %c0_i32 : i32, i32, i32
  }
  func.func @transform_1(%arg0: i32, %arg1: i32) -> (i32, i32) {
    %c0_i32 = arith.constant 0 : i32
    %c0_i32_0 = arith.constant 0 : i32
    %c0_i32_1 = arith.constant 0 : i32
    return %c0_i32, %c0_i32_0 : i32, i32
  }
  func.func @transform_2(%arg0: i32, %arg1: i32) -> (i32, i32) {
    %c0_i32 = arith.constant 0 : i32
    %c0_i32_0 = arith.constant 0 : i32
    %c0_i32_1 = arith.constant 0 : i32
    return %c0_i32, %c0_i32_0 : i32, i32
  }
  func.func @transform_3(%arg0: i32, %arg1: i32) -> (i32, i32) {
    %c0_i32 = arith.constant 0 : i32
    %c0_i32_0 = arith.constant 0 : i32
    %c0_i32_1 = arith.constant 0 : i32
    return %c0_i32, %c0_i32_0 : i32, i32
  }
  func.func @transform_4(%arg0: i32, %arg1: i32) -> (i32, i32) {
    %c0_i32 = arith.constant 0 : i32
    %c0_i32_0 = arith.constant 0 : i32
    return %arg0, %c0_i32 : i32, i32
  }
  func.func @transform_5(%arg0: i32, %arg1: i32) -> (i32, i32) {
    %c0_i32 = arith.constant 0 : i32
    %c0_i32_0 = arith.constant 0 : i32
    return %arg0, %c0_i32 : i32, i32
  }
  func.func @transform_6(%arg0: i32, %arg1: i32) -> (i32, i32, i32) {
    %c0_i32 = arith.constant 0 : i32
    %c0_i32_0 = arith.constant 0 : i32
    return %arg1, %arg0, %c0_i32 : i32, i32, i32
  }
  func.func @transform_7(%arg0: i32, %arg1: i32) -> (i32, i32) {
    %c0_i32 = arith.constant 0 : i32
    %c0_i32_0 = arith.constant 0 : i32
    return %arg0, %c0_i32 : i32, i32
  }
  func.func @transform_8(%arg0: i32, %arg1: i32) -> (i32, i32) {
    %c0_i32 = arith.constant 0 : i32
    %c0_i32_0 = arith.constant 0 : i32
    return %arg0, %c0_i32 : i32, i32
  }
}

</mosaic_0001>

<bundles_post_ra>
// kernel: tpu_custom_call.1
= control target key start
LH: loop header
LB: loop body
LE: loop exit
PB: predicated region body
PF: predicated region fallthrough
CT: control target
= control target key end

     0   :  { %14 = vsyncpa [#allocation6], 0  ;;  %s707_s0 = inlined_call_operand.hbm [shape: f32[1,8,32], index: 0, kind: input, shape index: {}]   ;;  %s708_s1 = inlined_call_operand.hbm [shape: f32[32,128], index: 1, kind: input, shape index: {}]   ;;  %s709_s2 = inlined_call_operand.hbm [shape: f32[32,128], index: 2, kind: input, shape index: {}]   ;;  %s710_s3 = inlined_call_operand.vmem [shape: f32[1,128], index: 3, kind: input, shape index: {}]   ;;  %s711_s4 = inlined_call_operand.vmem [shape: f32[8,32], index: 4, kind: input, shape index: {}]   ;;  %s712_s5 = inlined_call_operand.vmem [shape: f32[8,32], index: 5, kind: input, shape index: {}]   ;;  %s713_s6 = inlined_call_operand.hbm [shape: f32[1,8,32], index: 6, kind: output, shape index: {0}]   ;;  %s714_s7 = inlined_call_operand.hbm [shape: f32[8,32], index: 7, kind: output, shape index: {1}]   ;;  %s715_s8 = inlined_call_operand.hbm [shape: f32[8,32], index: 8, kind: output, shape index: {2}]  }
   0x1   :  { %15 = vsyncpa [#allocation9], 0 }
   0x2   :  { %16 = vsyncpa [#allocation7], 0 }
   0x3   :  { %17 = vsyncpa [#allocation13], 0  ;;  %s538_s27 = smov [#allocation8]   ;;  %s398_s9 = scalar_lea.hbm %s708_s1, 512 }
   0x4   :  { %s33_s28 = sshll.u32 %s538_s27, 4  ;;  %p399_p0 = scmp.ne.s32.totalorder %s708_s1, %s398_s9  ;;  %s34_s28 = int_to_ptr.vmem [resolvable:$true] %s33_s28 }
   0x5   :  { %p402_p1 = scmp.lt.u32.totalorder %s398_s9, %s708_s1 }
   0x7   :  { %p404_p2 = pnand %p402_p1, %p399_p0 }
   0x9   :  { %407 = shalt.err (!%p404_p2)
}
   0xa   :  { %s408_s14 = scalar_lea.vmem %s34_s28, 512  ;;  %p413_p4 = scmp.lt.s32.totalorder %s34_s28, %s34_s28 }
   0xb   :  { %p409_p3 = scmp.ne.s32.totalorder %s34_s28, %s408_s14  ;;  %p414_p5 = scmp.lt.s32.totalorder %s408_s14, %s408_s14 }
   0xd   :  { %p415_p6 = por %p414_p5, %p413_p4 }
   0xf   :  { %p416_p7 = pnand %p415_p6, %p409_p3 }
  0x11   :  { %419 = shalt.err (!%p416_p7)
}
  0x12   :  { %s539_s15 = smov 128   ;;  %s540_s16 = smov 8  }
  0x13   :  { %39 = dma.hbm_to_vmem [thread:$0]  %s708_s1, 512, %s34_s28, [#allocation9], %s539_s15, %s539_s15, %s540_s16  }
  0x14   :  { %s541_s19 = smov [#allocation5]   ;;  %s542_s21 = smov [#allocation10]  }
  0x15   :  { %s24_s20 = sshll.u32 %s541_s19, 4  ;;  %s45_s22 = sshll.u32 %s542_s21, 4  ;;  %s25_s20 = int_to_ptr.vmem [resolvable:$true] %s24_s20  ;;  %s46_s22 = int_to_ptr.vmem [resolvable:$true] %s45_s22 }
  0x16   :  { %s420_s25 = scalar_lea.hbm %s707_s0, 128 }
  0x17   :  { %p421_p8 = scmp.ne.s32.totalorder %s707_s0, %s420_s25  ;;  %p424_p9 = scmp.lt.u32.totalorder %s420_s25, %s707_s0 }
  0x19   :  { %p426_p10 = pnand %p424_p9, %p421_p8 }
  0x1b   :  { %429 = shalt.err (!%p426_p10)
}
  0x1c   :  { %s430_s1 = scalar_lea.vmem %s25_s20, 128  ;;  %p435_p12 = scmp.lt.s32.totalorder %s25_s20, %s25_s20 }
  0x1d   :  { %p431_p11 = scmp.ne.s32.totalorder %s25_s20, %s430_s1  ;;  %p436_p13 = scmp.lt.s32.totalorder %s430_s1, %s430_s1 }
  0x1f   :  { %p437_p0 = por %p436_p13, %p435_p12 }
  0x21   :  { %p438_p1 = pnand %p437_p0, %p431_p11 }
  0x23   :  { %441 = shalt.err (!%p438_p1)
}
  0x24   :  { %27 = dma.hbm_to_vmem [thread:$0]  %s707_s0, 128, %s25_s20, [#allocation6]  }
  0x25   :  { %s442_s12 = scalar_lea.hbm %s709_s2, 512 }
  0x26   :  { %p443_p2 = scmp.ne.s32.totalorder %s709_s2, %s442_s12  ;;  %p446_p3 = scmp.lt.u32.totalorder %s442_s12, %s709_s2 }
  0x28   :  { %p448_p4 = pnand %p446_p3, %p443_p2 }
  0x2a   :  { %451 = shalt.err (!%p448_p4)
}
  0x2b   :  { %s452_s19 = scalar_lea.vmem %s46_s22, 512  ;;  %p457_p6 = scmp.lt.s32.totalorder %s46_s22, %s46_s22 }
  0x2c   :  { %p453_p5 = scmp.ne.s32.totalorder %s46_s22, %s452_s19  ;;  %p458_p7 = scmp.lt.s32.totalorder %s452_s19, %s452_s19 }
  0x2e   :  { %p459_p8 = por %p458_p7, %p457_p6 }
  0x30   :  { %p460_p9 = pnand %p459_p8, %p453_p5 }
  0x32   :  { %463 = shalt.err (!%p460_p9)
}
  0x33   :  { %51 = dma.hbm_to_vmem [thread:$0]  %s709_s2, 512, %s46_s22, [#allocation9], %s539_s15, %s539_s15, %s540_s16  }
  0x34   :  { %530 = dma.done.wait [#allocation6], 128  }
  0x35   :  { %531 = vsyncadd [#allocation6], 4294967168 }
  0x36   :  { %532 = dma.done.wait [#allocation9], 1024  }
  0x37   :  { %533 = vsyncadd [#allocation9], 4294966272  ;;  %v543_v0 = vmov 0.0|0.0   ;;  %vm544_vm0 = vmmov 0   ;;  %v545_v1 = vmov 0.0   ;;  %v77_v2 = vld [vmem:[#allocation8] sm:$0xff] }
  0x38   :  { %364 = vmatprep.subr.bf16.mxu1 %v543_v0  ;;  %370 = vmatprep.subr.bf16.mxu0 %v543_v0  ;;  %v78_v3 = vld [vmem:[#allocation8 + $0x8] sm:$0xff]  ;;  %v166_v4 = vld [vmem:[#allocation10] sm:$0xff]  ;;  %v79_v7 = vld [vmem:[#allocation8 + $0x10] sm:$0xff]  ;;  %vm72_vm1 = vcmask 261120   ;;  %s546_s23 = smov 32   ;;  %s549_s24 = smov [#allocation12]  }
  0x39   :  { %350 = vmatprep.mubr.msk.f32.mxu1 %vm544_vm0, %v545_v1  ;;  %361 = vmatprep.mubr.msk.f32.mxu0 %vm544_vm0, %v545_v1  ;;  %v365_v5 = vpack.c.bf16 %v78_v3, %v77_v2  ;;  %v167_v6 = vld [vmem:[#allocation10 + $0x8] sm:$0xff]  ;;  %v80_v8 = vld [vmem:[#allocation8 + $0x18] sm:$0xff]  ;;  %v168_v10 = vld [vmem:[#allocation10 + $0x10] sm:$0xff]  ;;  %s302_s25 = sshll.u32 %s549_s24, 4  ;;  %s550_s26 = smov [#allocation11]   ;;  %s303_s25 = int_to_ptr.vmem [resolvable:$true] %s302_s25 }
  0x3a   :  { %v371_v9 = vpack.c.bf16 %v167_v6, %v166_v4  ;;  %v169_v11 = vld [vmem:[#allocation10 + $0x18] sm:$0xff]  ;;  %v368_v12 = vpack.c.bf16 %v80_v8, %v79_v7  ;;  %v71_v13 = vld [vmem:[%s711_s4] sm:$0xff]  ;;  %s292_s27 = sshll.u32 %s550_s26, 4  ;;  %s551_s29 = smov [#allocation14]   ;;  %s654_s27 = int_to_ptr.vmem [resolvable:$true] %s292_s27 }
  0x3b   :  { %366 = vmatpush3.bf16.msra.mxu1 %v365_v5  ;;  %v374_v14 = vpack.c.bf16 %v169_v11, %v168_v10  ;;  %73 = vst.msk [vmem:[#allocation3] sm:$0xff] %vm72_vm1, %v71_v13  ;;  %v76_v15 = vld [vmem:[#allocation5] sm:$0xff]  ;;  %v74_v17 = vld [vmem:[%s712_s5] sm:$0xff]  ;;  %s548_s5 = smov 64   ;;  %s312_s30 = sshll.u32 %s551_s29, 4  ;;  %s659_s30 = int_to_ptr.vmem [resolvable:$true] %s312_s30 }
  0x3c   :  { %372 = vmatpush3.bf16.msra.mxu0 %v371_v9  ;;  %367 = vmatprep.subr.bf16.mxu1 %v543_v0  ;;  %75 = vst.msk [vmem:[#allocation4] sm:$0xff] %vm72_vm1, %v74_v17  ;;  %v329_v18 = vld [vmem:[%s710_s3] ss:$0 sm:$0xff]  ;;  %s547_s3 = smov 96   ;;  %s464_s1 = scalar_lea.vmem %s303_s25, 128 }
  0x3d   :  { %373 = vmatprep.subr.bf16.mxu0 %v543_v0  ;;  %p465_p10 = scmp.ne.s32.totalorder %s303_s25, %s464_s1  ;;  %p469_p11 = scmp.lt.s32.totalorder %s303_s25, %s303_s25 }
  0x3e   :  { %p470_p12 = scmp.lt.s32.totalorder %s464_s1, %s464_s1 }
  0x3f   :  { %369 = vmatpush3.bf16.msra.mxu1 %v368_v12 }
  0x40   :  { %375 = vmatpush3.bf16.msra.mxu0 %v374_v14  ;;  %p471_p13 = por %p470_p12, %p469_p11 }
  0x42   :  { %351 = vmatmul.mubr.msk.f32.vlgmr.msra.gmra.mrb[0].mxu1 %vm72_vm1, %v76_v15  ;;  %v163_v16 = vld [vmem:[#allocation3] sm:$0xff]  ;;  %p472_p0 = pnand %p471_p13, %p465_p10 }
  0x43   :  { %362 = vmatmul.mubr.msk.f32.vlgmr.msra.gmra.mrb[0].mxu0 %vm72_vm1, %v163_v16  ;;  %v164_v26 = vld [vmem:[#allocation4] sm:$0xff] }
 0x115   :  { %v158_v19 = vpop.f32.mrb[0].mxu1 }
 0x116   :  { %v159_v20 = vadd.f32 %v329_v18, %v158_v19  ;;  %v352_v21 = vpop.f32.mrb[1].mxu1  ;;  %v239_v22 = vpop.f32.mrb[0].mxu0 }
 0x117   :  { %v363_v24 = vpop.f32.mrb[1].mxu0 }
 0x118   :  { %v243_v23 = vadd.f32 %v239_v22, %v159_v20 }
 0x11a   :  { %392 = vtanh.f32 %v243_v23  ;;  %v244_v27 = vmul.f32 0.5, %v243_v23 }
 0x11c   :  { %394 = vtanh.f32 %v244_v27 }
 0x124   :  { %v393_v25 = vpop.eup %392 }
 0x125   :  { %255 = vrot.lane.b32.xlu0 %v393_v25, %s546_s23 }
 0x126   :  { %v395_v28 = vpop.eup %394 }
 0x127   :  { %v246_v29 = vmul.f32 0.5, %v395_v28 }
 0x129   :  { %250 = vrot.lane.b32.xlu0 %v164_v26, %s546_s23  ;;  %v247_v30 = vadd.f32 0.5, %v246_v29 }
 0x197   :  { %v256_v31 = vpop.permute.xlu0 %255 }
 0x198   :  { %v258_v32 = vmul.f32 %v256_v31, %v247_v30 }
 0x19a   :  { %260 = vrot.lane.b32.xlu1 %v258_v32, %s546_s23 }
 0x19b   :  { %v251_v33 = vpop.permute.xlu0 %250 }
 0x19c   :  { %v253_v34 = vmul.f32 %v251_v33, %v247_v30 }
 0x20c   :  { %v261_v35 = vpop.permute.xlu1 %260 }
 0x20d   :  { %v263_v36 = vadd.f32 %v261_v35, %v253_v34 }
 0x20f   :  { %396 = vtanh.f32 %v263_v36 }
 0x219   :  { %v397_v37 = vpop.eup %396 }
 0x21a   :  { %266 = vrot.lane.b32.xlu1 %v397_v37, %s546_s23 }
 0x21e   :  { %277 = vrot.lane.b32.xlu1 %v263_v36, %s547_s3 }
 0x28c   :  { %v267_v38 = vpop.permute.xlu1 %266 }
 0x28d   :  { %v269_v39 = vmul.f32 %v267_v38, %v247_v30 }
 0x28f   :  { %271 = vrot.lane.b32.xlu0 %v269_v39, %s548_s5 }
 0x290   :  { %v278_v40 = vpop.permute.xlu1 %277 }
 0x291   :  { %280 = vst.msk [vmem:[#allocation4] sm:$0xff] %vm72_vm1, %v278_v40  ;;  %285 = vst.msk [vmem:[#allocation14] sm:$0xff] %vm72_vm1, %v278_v40 }
 0x301   :  { %v272_v41 = vpop.permute.xlu0 %271 }
 0x302   :  { %275 = vst.msk [vmem:[#allocation3] sm:$0xff] %vm72_vm1, %v272_v41  ;;  %274 = vst.msk [vmem:[#allocation11] sm:$0xff] %vm72_vm1, %v272_v41 }
 0x303   :  { %284 = vst.msk [vmem:[#allocation12] sm:$0xff] %vm72_vm1, %v272_v41 }
 0x304   :  { %475 = shalt.err (!%p472_p0)
}
 0x305   :  { %s476_s10 = scalar_lea.hbm %s714_s7, 128 }
 0x306   :  { %p477_p1 = scmp.ne.s32.totalorder %s714_s7, %s476_s10  ;;  %p480_p2 = scmp.lt.u32.totalorder %s476_s10, %s714_s7 }
 0x308   :  { %p482_p3 = pnand %p480_p2, %p477_p1 }
 0x30a   :  { %485 = shalt.err (!%p482_p3)
}
 0x30b   :  { %305 = dma.vmem_to_hbm [thread:$0]  %s303_s25, 128, %s714_s7, [#allocation13]  }
 0x30c   :  { %s486_s19 = scalar_lea.vmem %s654_s27, 128  ;;  %p491_p5 = scmp.lt.s32.totalorder %s654_s27, %s654_s27 }
 0x30d   :  { %p487_p4 = scmp.ne.s32.totalorder %s654_s27, %s486_s19  ;;  %p492_p6 = scmp.lt.s32.totalorder %s486_s19, %s486_s19 }
 0x30f   :  { %p493_p7 = por %p492_p6, %p491_p5 }
 0x311   :  { %p494_p8 = pnand %p493_p7, %p487_p4 }
 0x313   :  { %497 = shalt.err (!%p494_p8)
}
 0x314   :  { %s498_s2 = scalar_lea.hbm %s713_s6, 128 }
 0x315   :  { %p499_p9 = scmp.ne.s32.totalorder %s713_s6, %s498_s2  ;;  %p502_p10 = scmp.lt.u32.totalorder %s498_s2, %s713_s6 }
 0x317   :  { %p504_p11 = pnand %p502_p10, %p499_p9 }
 0x319   :  { %507 = shalt.err (!%p504_p11)
}
 0x31a   :  { %295 = dma.vmem_to_hbm [thread:$0]  %s654_s27, 128, %s713_s6, [#allocation7]  }
 0x31b   :  { %s508_s23 = scalar_lea.vmem %s659_s30, 128  ;;  %p513_p13 = scmp.lt.s32.totalorder %s659_s30, %s659_s30 }
 0x31c   :  { %p509_p12 = scmp.ne.s32.totalorder %s659_s30, %s508_s23  ;;  %p514_p0 = scmp.lt.s32.totalorder %s508_s23, %s508_s23 }
 0x31e   :  { %p515_p1 = por %p514_p0, %p513_p13 }
 0x320   :  { %p516_p2 = pnand %p515_p1, %p509_p12 }
 0x322   :  { %519 = shalt.err (!%p516_p2)
}
 0x323   :  { %s520_s24 = scalar_lea.hbm %s715_s8, 128 }
 0x324   :  { %p521_p3 = scmp.ne.s32.totalorder %s715_s8, %s520_s24  ;;  %p524_p4 = scmp.lt.u32.totalorder %s520_s24, %s715_s8 }
 0x326   :  { %p526_p5 = pnand %p524_p4, %p521_p3 }
 0x328   :  { %529 = shalt.err (!%p526_p5)
}
 0x329   :  { %315 = dma.vmem_to_hbm [thread:$0]  %s659_s30, 128, %s715_s8, [#allocation13]  }
 0x32a   :  { %534 = dma.done.wait [#allocation7], 128  }
 0x32b   :  { %535 = vsyncadd [#allocation7], 4294967168 }
 0x32c   :  { %536 = dma.done.wait [#allocation13], 256  }
 0x32d   :  { %537 = vsyncadd [#allocation13], 4294967040 }
 0x32e   :  { %325 = vsyncpa [#allocation6], 1 }
 0x32f   :  { %326 = vsyncpa [#allocation9], 1 }
 0x330   :  { %327 = vsyncpa [#allocation7], 1 }
 0x331   :  { %328 = vsyncpa [#allocation13], 1 }

</bundles_post_ra>
